<compile_context>
chip_gen: v6e
topology: v6e:2x2x1
jax: 0.10.0
libtpu: 0.0.40
codegen_flags: <defaults>
</compile_context>

<pallas_src>
import functools

import jax
import jax.numpy as jnp
from jax import lax
from jax.experimental import pallas as pl
from jax.experimental.pallas import tpu as pltpu

LANE = 128
EPS = 1e-8


def _partial_kernel(x_ref, t_ref, m_ref, out_ref, acc_ref, *,
                    tr, chunk, steps, rows, needs_mask, approx):
    """Accumulate per-(sublane,lane) partial sums of (bce, p*m*t*m, p*m, t*m)."""
    s = pl.program_id(0)
    j = pl.program_id(1)

    @pl.when(j == 0)
    def _():
        acc_ref[...] = jnp.zeros_like(acc_ref)

    # Global row index of this tile's first row (UN-clamped: duplicated /
    # out-of-range blocks land entirely past `rows` and mask to zero).
    tile_row0 = (s * steps + j) * tr
    n_chunks = tr // chunk

    def body(c, carry):
        a_bce, a_i, a_p, a_t = carry
        r0 = c * chunk
        x = x_ref[pl.ds(pl.multiple_of(r0, chunk), chunk), :].astype(jnp.float32)
        t = t_ref[pl.ds(pl.multiple_of(r0, chunk), chunk), :].astype(jnp.float32)
        m = m_ref[pl.ds(pl.multiple_of(r0, chunk), chunk), :].astype(jnp.float32)

        if needs_mask:
            row = lax.broadcasted_iota(jnp.int32, (chunk, LANE), 0)
            valid = (row + (tile_row0 + r0)) < rows
            # (x=0, t=1, m=0) contributes exactly 0 to all four sums and is
            # NaN/Inf-proof against garbage in out-of-bounds rows.
            x = jnp.where(valid, x, 0.0)
            t = jnp.where(valid, t, 1.0)
            m = jnp.where(valid, m, 0.0)

        # Shared transcendental: e = exp(-|x|)
        e = jnp.exp(-jnp.abs(x))
        # Numerically stable softplus(-x) = max(-x, 0) + log1p(exp(-|x|))
        sp_negx = jnp.maximum(-x, 0.0) + jnp.log1p(e)
        # BCEWithLogitsLoss(pos_weight=m) elementwise:
        #   (1 - t) * x + (1 + (pw - 1) * t) * softplus(-x)
        bce = (1.0 - t) * x + (1.0 + (m - 1.0) * t) * sp_negx
        # sigmoid(x) reusing e; divide pushed to the EUP reciprocal slot.
        inv = pl.reciprocal(1.0 + e, approx=approx)
        sig = jnp.where(x >= 0.0, 1.0, e) * inv

        pm = sig * m   # masked probability
        tm = t * m     # masked target

        def fold(v):   # (chunk,128) -> (8,128), sublane-aligned pure-VPU adds
            return jnp.sum(v.reshape(chunk // 8, 8, LANE), axis=0)

        return (a_bce + fold(bce), a_i + fold(pm * tm),
                a_p + fold(pm), a_t + fold(tm))

    z = jnp.zeros((8, LANE), jnp.float32)
    a_bce, a_i, a_p, a_t = lax.fori_loop(0, n_chunks, body, (z, z, z, z),
                                         unroll=True)

    acc_ref[0] += a_bce
    acc_ref[1] += a_i
    acc_ref[2] += a_p
    acc_ref[3] += a_t

    @pl.when(j == pl.num_programs(1) - 1)
    def _():
        out_ref[...] = acc_ref[...]


def masked_dice_bce_loss(logits, targets, maskmats, *, tile_rows=4096,
                         n_shards=2, approx_sigmoid=True):
    assert logits.shape == targets.shape == maskmats.shape
    total = logits.size                       # true element count (static int)

    x = logits.reshape(-1)
    t = targets.reshape(-1)
    m = maskmats.reshape(-1)

    # Smallest row count such that the flat arrays reshape to (rows, 128) with
    # at least 8 sublane rows; only the tail needed for that is ever padded.
    rows = max(pl.cdiv(total, LANE), 8)
    pad = rows * LANE - total
    if pad:
        # (x=0, t=1, m=0) contributes exactly 0 to all four accumulated sums.
        x = jnp.concatenate([x, jnp.zeros((pad,), x.dtype)])
        t = jnp.concatenate([t, jnp.ones((pad,), t.dtype)])
        m = jnp.concatenate([m, jnp.zeros((pad,), m.dtype)])

    x2 = x.reshape(rows, LANE)
    t2 = t.reshape(rows, LANE)
    m2 = m.reshape(rows, LANE)

    # Tile rows: multiple of 8, never larger than the array (a partial *last*
    # block is handled in-kernel; a block larger than the array is not used).
    tr = max(8, min((tile_rows // 8) * 8, (rows // 8) * 8))
    # Row-chunk processed per unrolled inner-loop step (keeps intermediates
    # chunk-sized / vreg-resident instead of full-tile VMEM temporaries).
    chunk = 256
    while tr % chunk:
        chunk //= 2

    n_blocks = pl.cdiv(rows, tr)
    n_shards = max(1, min(n_shards, n_blocks))
    steps = pl.cdiv(n_blocks, n_shards)
    covered = n_shards * steps * tr
    needs_mask = covered != rows              # ragged tail / duplicated blocks
    last_block = n_blocks - 1

    if n_shards * steps > n_blocks:
        # Clamp so no block *start* is out of bounds; duplicated blocks are
        # fully masked inside the kernel (their unclamped row range >= rows).
        def in_map(s, j):
            return (jnp.minimum(s * steps + j, last_block), 0)
    else:
        def in_map(s, j):
            return (s * steps + j, 0)

    tile_spec = pl.BlockSpec((tr, LANE), in_map)

    kernel = functools.partial(
        _partial_kernel, tr=tr, chunk=chunk, steps=steps, rows=rows,
        needs_mask=needs_mask, approx=approx_sigmoid)

    itembytes = sum(jnp.dtype(a.dtype).itemsize for a in (x2, t2, m2))
    step_in_bytes = tr * LANE * itembytes
    vmem_limit = int(min(max(2 * step_in_bytes + (8 << 20), 16 << 20), 40 << 20))

    cost = pl.CostEstimate(
        flops=32 * covered * LANE,
        transcendentals=3 * covered * LANE,
        bytes_accessed=rows * LANE * itembytes + n_shards * 4 * 8 * LANE * 4,
    )

    partials = pl.pallas_call(
        kernel,
        out_shape=jax.ShapeDtypeStruct((n_shards * 4, 8, LANE), jnp.float32),
        grid_spec=pltpu.PrefetchScalarGridSpec(
            num_scalar_prefetch=0,
            grid=(n_shards, steps),
            in_specs=[tile_spec, tile_spec, tile_spec],
            out_specs=pl.BlockSpec((4, 8, LANE), lambda s, j: (s, 0, 0)),
            scratch_shapes=[pltpu.VMEM((4, 8, LANE), jnp.float32)],
        ),
        compiler_params=pltpu.CompilerParams(
            dimension_semantics=("parallel", "arbitrary"),
            vmem_limit_bytes=vmem_limit,
        ),
        cost_estimate=cost,
    )(x2, t2, m2)

    # Final cross-shard / cross-lane collapse (tiny) in plain JAX.
    sums = partials.reshape(n_shards, 4, 8 * LANE).sum(axis=(0, 2))
    bce_loss = sums[0] / jnp.float32(total)        # mean over TRUE count
    intersection = 2.0 * sums[1]
    union = sums[2] + sums[3]
    dice_loss = 1.0 - (intersection + EPS) / (union + EPS)
    return bce_loss + dice_loss


def _reference(logits, targets, maskmats):
    x = logits.astype(jnp.float32)
    t = targets.astype(jnp.float32)
    m = maskmats.astype(jnp.float32)
    sp_negx = jnp.maximum(-x, 0.0) + jnp.log1p(jnp.exp(-jnp.abs(x)))
    bce = (1.0 - t) * x + (1.0 + (m - 1.0) * t) * sp_negx
    bce_loss = jnp.mean(bce)
    p = jax.nn.sigmoid(x) * m
    tt = t * m
    inter = 2.0 * jnp.sum(p * tt)
    union = jnp.sum(p) + jnp.sum(tt)
    dice_loss = 1.0 - (inter + EPS) / (union + EPS)
    return bce_loss + dice_loss


if __name__ == "__main__":
    key = jax.random.PRNGKey(0)

    def make(shape, kk, tm_dtype=jnp.float32):
        k1, k2, k3 = jax.random.split(kk, 3)
        lg = jax.random.normal(k1, shape, dtype=jnp.float32)
        tg = jax.random.bernoulli(k2, 0.4, shape).astype(tm_dtype)
        mk = jax.random.bernoulli(k3, 0.7, shape).astype(tm_dtype)
        return lg, tg, mk

    k0, k1, k2, k3 = jax.random.split(key, 4)

    # 1) Aligned shape (2048 elements = 16 lane-rows): approx & exact sigmoid.
    lg, tg, mk = make((2, 2, 4, 16, 8), k0)
    ref = _reference(lg, tg, mk)
    out = masked_dice_bce_loss(lg, tg, mk)                 # EUP approx recip
    jax.block_until_ready(out)
    assert jnp.allclose(out, ref, rtol=2e-3, atol=2e-3), (out, ref)
    out_exact = masked_dice_bce_loss(lg, tg, mk, approx_sigmoid=False)
    jax.block_until_ready(out_exact)
    assert jnp.allclose(out_exact, ref, rtol=1e-5, atol=1e-5), (out_exact, ref)

    # 2) Ragged element count (1890, not a multiple of 128): small tail pad
    #    plus in-kernel row-validity masking of the partial last block.
    lg, tg, mk = make((2, 3, 5, 7, 9), k1)
    ref = _reference(lg, tg, mk)
    out = masked_dice_bce_loss(lg, tg, mk, approx_sigmoid=False)
    jax.block_until_ready(out)
    assert jnp.allclose(out, ref, rtol=1e-5, atol=1e-5), (out, ref)

    # 3) Multi-step / multi-shard grid with duplicated-block clamping
    #    (528 lane-rows, tile_rows=64, 2 shards -> 10 blocks covering 9).
    lg, tg, mk = make((2, 4, 8, 32, 33), k2)
    ref = _reference(lg, tg, mk)
    out = masked_dice_bce_loss(lg, tg, mk, tile_rows=64, n_shards=2,
                               approx_sigmoid=False)
    jax.block_until_ready(out)
    assert jnp.allclose(out, ref, rtol=1e-5, atol=1e-5), (out, ref)

    # 4) bf16 targets / masks ({0,1}-exact): less HBM traffic, same result.
    lg, tg, mk = make((2, 2, 8, 16, 8), k3, tm_dtype=jnp.bfloat16)
    ref = _reference(lg, tg, mk)
    out = masked_dice_bce_loss(lg, tg, mk)
    jax.block_until_ready(out)
    assert jnp.allclose(out, ref, rtol=2e-3, atol=2e-3), (out, ref)

    print("KERNEL_OK")
</pallas_src>

<mosaic_0001>
module attributes {stable_mosaic.version = 11 : i64} {
  func.func @_partial_kernel(%arg0: i32, %arg1: i32, %arg2: memref<16x128xf32, #tpu.memory_space<vmem>>, %arg3: memref<16x128xf32, #tpu.memory_space<vmem>>, %arg4: memref<16x128xf32, #tpu.memory_space<vmem>>, %arg5: memref<4x8x128xf32, #tpu.memory_space<vmem>>, %arg6: memref<4x8x128xf32, #tpu.memory_space<vmem>>) attributes {dimension_semantics = [#tpu.dimension_semantics<parallel>, #tpu.dimension_semantics<arbitrary>], iteration_bounds = array<i64: 1, 1>, scalar_prefetch = 0 : i64, scratch_operands = 1 : i64, tpu.core_type = #tpu.core_type<tc>, window_params = [{transform_indices = @transform_0, window_bounds = array<i64: 16, 128>}, {transform_indices = @transform_1, window_bounds = array<i64: 16, 128>}, {transform_indices = @transform_2, window_bounds = array<i64: 16, 128>}, {transform_indices = @transform_3, window_bounds = array<i64: 4, 8, 128>}]} {
    %c0_i32 = arith.constant 0 : i32
    %0 = arith.cmpi eq, %arg1, %c0_i32 : i32
    %1 = arith.extui %0 : i1 to i32
    %c0_i32_0 = arith.constant 0 : i32
    %2 = arith.cmpi ne, %1, %c0_i32_0 : i32
    scf.if %2 {
      %cst_40 = arith.constant 0.000000e+00 : f32
      %84 = vector.broadcast %cst_40 : f32 to vector<4x8x128xf32>
      %c0_41 = arith.constant 0 : index
      %c0_42 = arith.constant 0 : index
      %c0_43 = arith.constant 0 : index
      %85 = vector.load %arg6[%c0_41, %c0_42, %c0_43] : memref<4x8x128xf32, #tpu.memory_space<vmem>>, vector<4x8x128xf32>
      tpu.vector_store %arg6[%c0_41, %c0_42, %c0_43], %84 {strides = array<i32>} : memref<4x8x128xf32, #tpu.memory_space<vmem>>, vector<4x8x128xf32>,
    } else {
    }
    %cst = arith.constant 0.000000e+00 : f32
    %3 = vector.broadcast %cst : f32 to vector<8x128xf32>
    %c0_i32_1 = arith.constant 0 : i32
    %c16_i32 = arith.constant 16 : i32
    %4 = arith.muli %c0_i32_1, %c16_i32 : i32
    %5 = tpu.assume_multiple %4, 16 : i32
    %6 = arith.index_cast %5 : i32 to index
    %c0 = arith.constant 0 : index
    %7 = vector.load %arg2[%6, %c0] : memref<16x128xf32, #tpu.memory_space<vmem>>, vector<16x128xf32>
    %8 = tpu.assume_multiple %4, 16 : i32
    %9 = arith.index_cast %8 : i32 to index
    %c0_2 = arith.constant 0 : index
    %10 = vector.load %arg3[%9, %c0_2] : memref<16x128xf32, #tpu.memory_space<vmem>>, vector<16x128xf32>
    %11 = tpu.assume_multiple %4, 16 : i32
    %12 = arith.index_cast %11 : i32 to index
    %c0_3 = arith.constant 0 : index
    %13 = vector.load %arg4[%12, %c0_3] : memref<16x128xf32, #tpu.memory_space<vmem>>, vector<16x128xf32>
    %14 = math.absf %7 : vector<16x128xf32>
    %cst_4 = arith.constant 0.000000e+00 : f32
    %15 = vector.broadcast %cst_4 : f32 to vector<16x128xf32>
    %16 = arith.subf %15, %14 : vector<16x128xf32>
    %17 = math.exp %16 : vector<16x128xf32>
    %cst_5 = arith.constant 0.000000e+00 : f32
    %18 = vector.broadcast %cst_5 : f32 to vector<16x128xf32>
    %19 = arith.subf %18, %7 : vector<16x128xf32>
    %cst_6 = arith.constant 0.000000e+00 : f32
    %20 = vector.broadcast %cst_6 : f32 to vector<16x128xf32>
    %21 = arith.maximumf %19, %20 : vector<16x128xf32>
    %22 = math.log1p %17 : vector<16x128xf32>
    %23 = arith.addf %21, %22 : vector<16x128xf32>
    %cst_7 = arith.constant 1.000000e+00 : f32
    %24 = vector.broadcast %cst_7 : f32 to vector<16x128xf32>
    %25 = arith.subf %24, %10 : vector<16x128xf32>
    %26 = arith.mulf %25, %7 : vector<16x128xf32>
    %cst_8 = arith.constant 1.000000e+00 : f32
    %27 = vector.broadcast %cst_8 : f32 to vector<16x128xf32>
    %28 = arith.subf %13, %27 : vector<16x128xf32>
    %29 = arith.mulf %28, %10 : vector<16x128xf32>
    %cst_9 = arith.constant 1.000000e+00 : f32
    %30 = vector.broadcast %cst_9 : f32 to vector<16x128xf32>
    %31 = arith.addf %30, %29 : vector<16x128xf32>
    %32 = arith.mulf %31, %23 : vector<16x128xf32>
    %33 = arith.addf %26, %32 : vector<16x128xf32>
    %cst_10 = arith.constant 1.000000e+00 : f32
    %34 = vector.broadcast %cst_10 : f32 to vector<16x128xf32>
    %35 = arith.addf %34, %17 : vector<16x128xf32>
    %36 = tpu.reciprocal %35 {approx = true} : vector<16x128xf32> -> vector<16x128xf32>
    %cst_11 = arith.constant 0.000000e+00 : f32
    %37 = vector.broadcast %cst_11 : f32 to vector<16x128xf32>
    %38 = arith.cmpf oge, %7, %37 : vector<16x128xf32>
    %cst_12 = arith.constant 1.000000e+00 : f32
    %39 = vector.broadcast %cst_12 : f32 to vector<16x128xf32>
    %40 = arith.select %38, %39, %17 : vector<16x128xi1>, vector<16x128xf32>
    %41 = arith.mulf %40, %36 : vector<16x128xf32>
    %42 = arith.mulf %41, %13 : vector<16x128xf32>
    %43 = arith.mulf %10, %13 : vector<16x128xf32>
    %44 = vector.shape_cast %33 : vector<16x128xf32> to vector<2x8x128xf32>
    %cst_13 = arith.constant dense<0.000000e+00> : vector<8x128xf32>
    %45 = vector.multi_reduction <add>, %44, %cst_13 [0] : vector<2x8x128xf32> to vector<8x128xf32>
    %46 = arith.addf %3, %45 : vector<8x128xf32>
    %47 = arith.mulf %42, %43 : vector<16x128xf32>
    %48 = vector.shape_cast %47 : vector<16x128xf32> to vector<2x8x128xf32>
    %cst_14 = arith.constant dense<0.000000e+00> : vector<8x128xf32>
    %49 = vector.multi_reduction <add>, %48, %cst_14 [0] : vector<2x8x128xf32> to vector<8x128xf32>
    %50 = arith.addf %3, %49 : vector<8x128xf32>
    %51 = vector.shape_cast %42 : vector<16x128xf32> to vector<2x8x128xf32>
    %cst_15 = arith.constant dense<0.000000e+00> : vector<8x128xf32>
    %52 = vector.multi_reduction <add>, %51, %cst_15 [0] : vector<2x8x128xf32> to vector<8x128xf32>
    %53 = arith.addf %3, %52 : vector<8x128xf32>
    %54 = vector.shape_cast %43 : vector<16x128xf32> to vector<2x8x128xf32>
    %cst_16 = arith.constant dense<0.000000e+00> : vector<8x128xf32>
    %55 = vector.multi_reduction <add>, %54, %cst_16 [0] : vector<2x8x128xf32> to vector<8x128xf32>
    %56 = arith.addf %3, %55 : vector<8x128xf32>
    %c1_i32 = arith.constant 1 : i32
    %c0_17 = arith.constant 0 : index
    %c0_18 = arith.constant 0 : index
    %c0_19 = arith.constant 0 : index
    %57 = vector.load %arg6[%c0_17, %c0_18, %c0_19] : memref<4x8x128xf32, #tpu.memory_space<vmem>>, vector<1x8x128xf32>
    %58 = vector.shape_cast %57 : vector<1x8x128xf32> to vector<8x128xf32>
    %59 = arith.addf %58, %46 : vector<8x128xf32>
    %c0_20 = arith.constant 0 : index
    %c0_21 = arith.constant 0 : index
    %c0_22 = arith.constant 0 : index
    %60 = vector.load %arg6[%c0_20, %c0_21, %c0_22] : memref<4x8x128xf32, #tpu.memory_space<vmem>>, vector<1x8x128xf32>
    %61 = vector.shape_cast %60 : vector<1x8x128xf32> to vector<8x128xf32>
    %62 = vector.shape_cast %59 : vector<8x128xf32> to vector<1x8x128xf32>
    tpu.vector_store %arg6[%c0_20, %c0_21, %c0_22], %62 {strides = array<i32>} : memref<4x8x128xf32, #tpu.memory_space<vmem>>, vector<1x8x128xf32>,
    %c1 = arith.constant 1 : index
    %c0_23 = arith.constant 0 : index
    %c0_24 = arith.constant 0 : index
    %63 = vector.load %arg6[%c1, %c0_23, %c0_24] : memref<4x8x128xf32, #tpu.memory_space<vmem>>, vector<1x8x128xf32>
    %64 = vector.shape_cast %63 : vector<1x8x128xf32> to vector<8x128xf32>
    %65 = arith.addf %64, %50 : vector<8x128xf32>
    %c1_25 = arith.constant 1 : index
    %c0_26 = arith.constant 0 : index
    %c0_27 = arith.constant 0 : index
    %66 = vector.load %arg6[%c1_25, %c0_26, %c0_27] : memref<4x8x128xf32, #tpu.memory_space<vmem>>, vector<1x8x128xf32>
    %67 = vector.shape_cast %66 : vector<1x8x128xf32> to vector<8x128xf32>
    %68 = vector.shape_cast %65 : vector<8x128xf32> to vector<1x8x128xf32>
    tpu.vector_store %arg6[%c1_25, %c0_26, %c0_27], %68 {strides = array<i32>} : memref<4x8x128xf32, #tpu.memory_space<vmem>>, vector<1x8x128xf32>,
    %c2 = arith.constant 2 : index
    %c0_28 = arith.constant 0 : index
    %c0_29 = arith.constant 0 : index
    %69 = vector.load %arg6[%c2, %c0_28, %c0_29] : memref<4x8x128xf32, #tpu.memory_space<vmem>>, vector<1x8x128xf32>
    %70 = vector.shape_cast %69 : vector<1x8x128xf32> to vector<8x128xf32>
    %71 = arith.addf %70, %53 : vector<8x128xf32>
    %c2_30 = arith.constant 2 : index
    %c0_31 = arith.constant 0 : index
    %c0_32 = arith.constant 0 : index
    %72 = vector.load %arg6[%c2_30, %c0_31, %c0_32] : memref<4x8x128xf32, #tpu.memory_space<vmem>>, vector<1x8x128xf32>
    %73 = vector.shape_cast %72 : vector<1x8x128xf32> to vector<8x128xf32>
    %74 = vector.shape_cast %71 : vector<8x128xf32> to vector<1x8x128xf32>
    tpu.vector_store %arg6[%c2_30, %c0_31, %c0_32], %74 {strides = array<i32>} : memref<4x8x128xf32, #tpu.memory_space<vmem>>, vector<1x8x128xf32>,
    %c3 = arith.constant 3 : index
    %c0_33 = arith.constant 0 : index
    %c0_34 = arith.constant 0 : index
    %75 = vector.load %arg6[%c3, %c0_33, %c0_34] : memref<4x8x128xf32, #tpu.memory_space<vmem>>, vector<1x8x128xf32>
    %76 = vector.shape_cast %75 : vector<1x8x128xf32> to vector<8x128xf32>
    %77 = arith.addf %76, %56 : vector<8x128xf32>
    %c3_35 = arith.constant 3 : index
    %c0_36 = arith.constant 0 : index
    %c0_37 = arith.constant 0 : index
    %78 = vector.load %arg6[%c3_35, %c0_36, %c0_37] : memref<4x8x128xf32, #tpu.memory_space<vmem>>, vector<1x8x128xf32>
    %79 = vector.shape_cast %78 : vector<1x8x128xf32> to vector<8x128xf32>
    %80 = vector.shape_cast %77 : vector<8x128xf32> to vector<1x8x128xf32>
    tpu.vector_store %arg6[%c3_35, %c0_36, %c0_37], %80 {strides = array<i32>} : memref<4x8x128xf32, #tpu.memory_space<vmem>>, vector<1x8x128xf32>,
    %c0_i32_38 = arith.constant 0 : i32
    %81 = arith.cmpi eq, %arg1, %c0_i32_38 : i32
    %82 = arith.extui %81 : i1 to i32
    %c0_i32_39 = arith.constant 0 : i32
    %83 = arith.cmpi ne, %82, %c0_i32_39 : i32
    scf.if %83 {
      %c0_40 = arith.constant 0 : index
      %c0_41 = arith.constant 0 : index
      %c0_42 = arith.constant 0 : index
      %84 = vector.load %arg6[%c0_40, %c0_41, %c0_42] : memref<4x8x128xf32, #tpu.memory_space<vmem>>, vector<4x8x128xf32>
      %c0_43 = arith.constant 0 : index
      %c0_44 = arith.constant 0 : index
      %c0_45 = arith.constant 0 : index
      %85 = vector.load %arg5[%c0_43, %c0_44, %c0_45] : memref<4x8x128xf32, #tpu.memory_space<vmem>>, vector<4x8x128xf32>
      tpu.vector_store %arg5[%c0_43, %c0_44, %c0_45], %84 {strides = array<i32>} : memref<4x8x128xf32, #tpu.memory_space<vmem>>, vector<4x8x128xf32>,
    } else {
    }
    return
  }
  func.func @transform_0(%arg0: i32, %arg1: i32) -> (i32, i32) {
    %c1_i32 = arith.constant 1 : i32
    %0 = arith.muli %arg0, %c1_i32 : i32
    %1 = arith.addi %0, %arg1 : i32
    %c0_i32 = arith.constant 0 : i32
    %c0_i32_0 = arith.constant 0 : i32
    return %1, %c0_i32 : i32, i32
  }
  func.func @transform_1(%arg0: i32, %arg1: i32) -> (i32, i32) {
    %c1_i32 = arith.constant 1 : i32
    %0 = arith.muli %arg0, %c1_i32 : i32
    %1 = arith.addi %0, %arg1 : i32
    %c0_i32 = arith.constant 0 : i32
    %c0_i32_0 = arith.constant 0 : i32
    return %1, %c0_i32 : i32, i32
  }
  func.func @transform_2(%arg0: i32, %arg1: i32) -> (i32, i32) {
    %c1_i32 = arith.constant 1 : i32
    %0 = arith.muli %arg0, %c1_i32 : i32
    %1 = arith.addi %0, %arg1 : i32
    %c0_i32 = arith.constant 0 : i32
    %c0_i32_0 = arith.constant 0 : i32
    return %1, %c0_i32 : i32, i32
  }
  func.func @transform_3(%arg0: i32, %arg1: i32) -> (i32, i32, i32) {
    %c0_i32 = arith.constant 0 : i32
    %c0_i32_0 = arith.constant 0 : i32
    %c0_i32_1 = arith.constant 0 : i32
    return %arg0, %c0_i32, %c0_i32_0 : i32, i32, i32
  }
}

</mosaic_0001>

<bundles_post_ra>
// kernel: tpu_custom_call.1
= control target key start
LH: loop header
LB: loop body
LE: loop exit
PB: predicated region body
PF: predicated region fallthrough
CT: control target
= control target key end

     0   :  { %8 = vsyncpa [#allocation4], 0  ;;  %s370_s0 = inlined_call_operand.hbm [shape: f32[16,128], index: 0, kind: input, shape index: {}]   ;;  %s371_s1 = inlined_call_operand.hbm [shape: f32[16,128], index: 1, kind: input, shape index: {}]   ;;  %s372_s2 = inlined_call_operand.hbm [shape: f32[16,128], index: 2, kind: input, shape index: {}]   ;;  %s373_s3 = inlined_call_operand.hbm [shape: f32[4,8,128], index: 3, kind: output, shape index: {}]  }
   0x1   :  { %9 = vsyncpa [#allocation7], 0 }
   0x2   :  { %10 = vsyncpa [#allocation5], 0  ;;  %s308_s12 = smov [#allocation6]   ;;  %s309_s14 = smov [#allocation3]  }
   0x3   :  { %s36_s13 = sshll.u32 %s308_s12, 4  ;;  %s20_s15 = sshll.u32 %s309_s14, 4  ;;  %s37_s13 = int_to_ptr.vmem [resolvable:$true] %s36_s13  ;;  %s21_s15 = int_to_ptr.vmem [resolvable:$true] %s20_s15 }
   0x4   :  { %s230_s16 = scalar_lea.vmem %s37_s13, 256  ;;  %p235_p1 = scmp.lt.s32.totalorder %s37_s13, %s37_s13 }
   0x5   :  { %p231_p0 = scmp.ne.s32.totalorder %s37_s13, %s230_s16  ;;  %p236_p2 = scmp.lt.s32.totalorder %s230_s16, %s230_s16 }
   0x7   :  { %p237_p3 = por %p236_p2, %p235_p1 }
   0x9   :  { %p238_p4 = pnand %p237_p3, %p231_p0 }
   0xb   :  { %241 = shalt.err (!%p238_p4)
}
   0xc   :  { %s310_s17 = smov 128   ;;  %s311_s18 = smov 8  }
   0xd   :  { %42 = dma.hbm_to_vmem [thread:$0]  %s371_s1, 256, %s37_s13, [#allocation7], %s310_s17, %s310_s17, %s311_s18  }
   0xe   :  { %s250_s21 = scalar_lea.vmem %s21_s15, 256  ;;  %p255_p6 = scmp.lt.s32.totalorder %s21_s15, %s21_s15 }
   0xf   :  { %p251_p5 = scmp.ne.s32.totalorder %s21_s15, %s250_s21  ;;  %p256_p7 = scmp.lt.s32.totalorder %s250_s21, %s250_s21 }
  0x11   :  { %p257_p8 = por %p256_p7, %p255_p6 }
  0x13   :  { %p258_p9 = pnand %p257_p8, %p251_p5 }
  0x15   :  { %261 = shalt.err (!%p258_p9)
}
  0x16   :  { %26 = dma.hbm_to_vmem [thread:$0]  %s370_s0, 256, %s21_s15, [#allocation4], %s310_s17, %s310_s17, %s311_s18  }
  0x17   :  { %s312_s24 = smov [#allocation8]  }
  0x18   :  { %s52_s25 = sshll.u32 %s312_s24, 4  ;;  %s53_s25 = int_to_ptr.vmem [resolvable:$true] %s52_s25 }
  0x19   :  { %s270_s26 = scalar_lea.vmem %s53_s25, 256  ;;  %p275_p11 = scmp.lt.s32.totalorder %s53_s25, %s53_s25 }
  0x1a   :  { %p271_p10 = scmp.ne.s32.totalorder %s53_s25, %s270_s26  ;;  %p276_p12 = scmp.lt.s32.totalorder %s270_s26, %s270_s26 }
  0x1c   :  { %p277_p13 = por %p276_p12, %p275_p11 }
  0x1e   :  { %p278_p0 = pnand %p277_p13, %p271_p10 }
  0x20   :  { %281 = shalt.err (!%p278_p0)
}
  0x21   :  { %58 = dma.hbm_to_vmem [thread:$0]  %s372_s2, 256, %s53_s25, [#allocation7], %s310_s17, %s310_s17, %s311_s18  }
  0x22   :  { %302 = dma.done.wait [#allocation4], 256  }
  0x23   :  { %303 = vsyncadd [#allocation4], 4294967040 }
  0x24   :  { %304 = dma.done.wait [#allocation7], 512  }
  0x25   :  { %305 = vsyncadd [#allocation7], 4294966784  ;;  %v82_v0 = vld [vmem:[#allocation3] sm:$0xff]  ;;  %v352_v1 = vld [vmem:[#allocation3 + $0x8] sm:$0xff]  ;;  %s313_s0 = smov [#allocation9]  }
  0x26   :  { %v88_v2 = vand.u32 2147483647, %v82_v0  ;;  %v89_v3 = vand.u32 2147483647, %v352_v1  ;;  %v84_v5 = vld [vmem:[#allocation6] sm:$0xff]  ;;  %v85_v7 = vld [vmem:[#allocation6 + $0x8] sm:$0xff] }
  0x27   :  { %v86_v8 = vld [vmem:[#allocation8] sm:$0xff]  ;;  %v87_v9 = vld [vmem:[#allocation8 + $0x8] sm:$0xff]  ;;  %v96_v24 = vsub.f32 0.0, %v82_v0  ;;  %v97_v27 = vsub.f32 0.0, %v352_v1  ;;  %vm138_vm0 = vcmp.ge.f32.partialorder %v82_v0, 0.0  ;;  %vm139_vm1 = vcmp.ge.f32.partialorder %v352_v1, 0.0 }
  0x28   :  { %v90_v4 = vsub.f32 0.0, %v88_v2  ;;  %v91_v6 = vsub.f32 0.0, %v89_v3  ;;  %v146_v12 = vmul.f32 %v86_v8, %v84_v5  ;;  %v147_v13 = vmul.f32 %v87_v9, %v85_v7  ;;  %s189_s2 = sshll.u32 %s313_s0, 4  ;;  %s190_s2 = int_to_ptr.vmem [resolvable:$true] %s189_s2 }
  0x29   :  { %v202_v21 = vadd.f32 -1.0, %v86_v8  ;;  %v203_v23 = vadd.f32 -1.0, %v87_v9  ;;  %v120_v31 = vsub.f32 1.0, %v84_v5  ;;  %v121_v32 = vsub.f32 1.0, %v85_v7  ;;  %s282_s28 = scalar_lea.vmem %s190_s2, 512  ;;  %p287_p2 = scmp.lt.s32.totalorder %s190_s2, %s190_s2 }
  0x2a   :  { %v92_v10 = vmul.f32 1.442695, %v90_v4  ;;  %v94_v11 = vmul.f32 1.442695, %v91_v6  ;;  %v156_v14 = vadd.f32 %v147_v13, %v146_v12  ;;  %v98_v35 = vmax.f32 %v96_v24, 0.0  ;;  %p283_p1 = scmp.ne.s32.totalorder %s190_s2, %s282_s28  ;;  %p288_p3 = scmp.lt.s32.totalorder %s282_s28, %s282_s28 }
  0x2b   :  { %v126_v29 = vmul.f32 %v202_v21, %v84_v5  ;;  %v127_v33 = vmul.f32 %v203_v23, %v85_v7  ;;  %v99_v40 = vmax.f32 %v97_v27, 0.0  ;;  %v122_v52 = vmul.f32 %v120_v31, %v82_v0 }
  0x2c   :  { %210 = vpow2.f32 %v92_v10  ;;  %183 = vst [vmem:[#allocation9 + $0x18] sm:$0xff] %v156_v14  ;;  %v123_v55 = vmul.f32 %v121_v32, %v352_v1  ;;  %p289_p4 = por %p288_p3, %p287_p2 }
  0x2d   :  { %212 = vpow2.f32 %v94_v11  ;;  %v128_v45 = vadd.f32 1.0, %v126_v29  ;;  %v129_v48 = vadd.f32 1.0, %v127_v33 }
  0x2e   :  { %p290_p5 = pnand %p289_p4, %p283_p1 }
  0x39   :  { %v211_v15 = vpop.eup %210 }
  0x3a   :  { %v213_v16 = vpop.eup %212  ;;  %v100_v17 = vadd.f32 1.0, %v211_v15  ;;  %v103_v19 = vmul.f32 -0.5, %v211_v15  ;;  %v106_v25 = vand.u32 2147483647, %v211_v15  ;;  %v140_v38 = vsel %vm138_vm0, 1.0, %v211_v15 }
  0x3b   :  { %v109_v18 = vadd.f32 1.0, %v213_v16  ;;  %v112_v20 = vmul.f32 -0.5, %v213_v16  ;;  %v115_v28 = vand.u32 2147483647, %v213_v16  ;;  %v141_v42 = vsel %vm139_vm1, 1.0, %v213_v16 }
  0x3c   :  { %214 = vlog2.f32 %v100_v17  ;;  %v104_v22 = vadd.f32 1.0, %v103_v19  ;;  %vm357_vm2 = vcmp.lt.f32.partialorder %v106_v25, 0.0004427343 }
  0x3d   :  { %216 = vlog2.f32 %v109_v18  ;;  %v113_v26 = vadd.f32 1.0, %v112_v20  ;;  %vm116_vm3 = vcmp.lt.f32.partialorder %v115_v28, 0.0004427343 }
  0x3e   :  { %218 = vrcp.f32 %v100_v17  ;;  %v105_v30 = vmul.f32 %v211_v15, %v104_v22 }
  0x3f   :  { %220 = vrcp.f32 %v109_v18  ;;  %v114_v37 = vmul.f32 %v213_v16, %v113_v26 }
  0x49   :  { %v215_v34 = vpop.eup %214 }
  0x4a   :  { %v217_v39 = vpop.eup %216  ;;  %v102_v41 = vmul.f32 0.6931472, %v215_v34 }
  0x4b   :  { %v219_v43 = vpop.eup %218  ;;  %v111_v44 = vmul.f32 0.6931472, %v217_v39 }
  0x4c   :  { %v221_v46 = vpop.eup %220  ;;  %v108_v47 = vsel %vm357_vm2, %v105_v30, %v102_v41  ;;  %v142_v49 = vmul.f32 %v219_v43, %v140_v38 }
  0x4d   :  { %v117_v50 = vsel %vm116_vm3, %v114_v37, %v111_v44  ;;  %v118_v51 = vadd.f32 %v108_v47, %v98_v35  ;;  %v143_v53 = vmul.f32 %v221_v46, %v141_v42 }
  0x4e   :  { %v119_v54 = vadd.f32 %v117_v50, %v99_v40  ;;  %v144_v56 = vmul.f32 %v142_v49, %v86_v8 }
  0x4f   :  { %v130_v57 = vmul.f32 %v128_v45, %v118_v51  ;;  %v145_v58 = vmul.f32 %v143_v53, %v87_v9 }
  0x50   :  { %v131_v59 = vmul.f32 %v129_v48, %v119_v54  ;;  %v150_v60 = vmul.f32 %v146_v12, %v144_v56 }
  0x51   :  { %v132_v61 = vadd.f32 %v130_v57, %v122_v52  ;;  %v151_v62 = vmul.f32 %v147_v13, %v145_v58  ;;  %v154_v63 = vadd.f32 %v145_v58, %v144_v56 }
  0x52   :  { %v133_v2 = vadd.f32 %v131_v59, %v123_v55 }
  0x53   :  { %v152_v3 = vadd.f32 %v151_v62, %v150_v60  ;;  %182 = vst [vmem:[#allocation9 + $0x10] sm:$0xff] %v154_v63 }
  0x54   :  { %v148_v4 = vadd.f32 %v133_v2, %v132_v61 }
  0x55   :  { %181 = vst [vmem:[#allocation9 + $0x8] sm:$0xff] %v152_v3 }
  0x56   :  { %180 = vst [vmem:[#allocation9] sm:$0xff] %v148_v4 }
  0x57   :  { %293 = shalt.err (!%p290_p5)
}
  0x58   :  { %195 = dma.vmem_to_hbm [thread:$0]  %s190_s2, 512, %s373_s3, [#allocation5], %s310_s17, %s310_s17, %s311_s18  }
  0x59   :  { %306 = dma.done.wait [#allocation5], 512  }
  0x5a   :  { %307 = vsyncadd [#allocation5], 4294966784 }
  0x5b   :  { %199 = vsyncpa [#allocation4], 1 }
  0x5c   :  { %200 = vsyncpa [#allocation7], 1 }
  0x5d   :  { %201 = vsyncpa [#allocation5], 1 }

</bundles_post_ra>
